<compile_context>
chip_gen: v7x
topology: tpu7x:2x2x1
jax: 0.10.0
libtpu: 0.0.40
codegen_flags: <defaults>
</compile_context>

<pallas_src>
import functools

import jax
import jax.numpy as jnp
from jax.experimental import pallas as pl
from jax.experimental.pallas import tpu as pltpu


def _round_up(x, m):
    return ((x + m - 1) // m) * m


# --------------------------------------------------------------------------
# Kernel
# --------------------------------------------------------------------------
def _attention_kernel(dec_ref, enc_ref, wd_ref, we_ref, b_ref, v_ref, out_ref,
                      *, true_s):
    # dec_ref : (Bt, Ddec)       decoder hidden rows (stream dtype)
    # enc_ref : (Bt, S_pad, Enc) encoder outputs (stream dtype)
    # wd_ref  : (Ddec, Dp)       attn columns for decoder_hidden, pre-transposed, Dp lane-padded
    # we_ref  : (Enc,  Dp)       attn columns for encoder_outputs, pre-transposed, Dp lane-padded
    # b_ref   : (1, Dp)          attn bias (f32, zero in padded lanes)
    # v_ref   : (1, Dp)          v weight row (f32, zero in padded lanes)
    # out_ref : (Bt, P)          packed f32 output slab: [context | weights | zero pad]
    bt, s_pad, enc_dim = enc_ref.shape

    dec = dec_ref[...]                                   # (Bt, Ddec)
    enc = enc_ref[...]                                   # (Bt, S_pad, Enc)
    bias = b_ref[...]                                    # (1, Dp) f32
    v_row = v_ref[...]                                   # (1, Dp) f32

    # Decoder projection (bias folded in), native MXU dtype:
    # bf16 x bf16 -> f32 on the streaming path, pure f32 on the f32 path.
    dec_proj = jnp.dot(dec, wd_ref[...],
                       preferred_element_type=jnp.float32) + bias        # (Bt, Dp)

    # Encoder projection: flatten (Bt, S) so the MXU sees M = Bt*S rows.
    enc_flat = enc.reshape(bt * s_pad, enc_dim)                           # (Bt*S, Enc)
    enc_proj = jnp.dot(enc_flat, we_ref[...],
                       preferred_element_type=jnp.float32)                # (Bt*S, Dp) f32

    dp = enc_proj.shape[-1]
    energy = jnp.tanh(enc_proj.reshape(bt, s_pad, dp)
                      + dec_proj[:, None, :])                             # (Bt, S_pad, Dp) f32

    # v-projection: VPU multiply + lane reduction (padded Dp lanes are zero in v).
    scores = jnp.sum(energy * v_row, axis=-1)                             # (Bt, S_pad) f32

    # Mask sequence-padding positions so they get zero softmax weight.
    if s_pad != true_s:
        col = jax.lax.broadcasted_iota(jnp.int32, scores.shape, 1)
        scores = jnp.where(col < true_s, scores, -1e30)

    # Row-wise, max-stabilized softmax over the sequence axis (exact divide).
    m = jnp.max(scores, axis=-1, keepdims=True)                           # (Bt, 1)
    e = jnp.exp(scores - m)                                               # (Bt, S_pad)
    w = e / jnp.sum(e, axis=-1, keepdims=True)                            # (Bt, S_pad) f32

    # Context = bmm(w, enc).  f32 path: exact VPU multiply + sublane reduce
    # (enc is already f32, no extra slab).  Streaming path: native
    # bf16 x bf16 -> f32 batched contraction, no f32 copy of the encoder slab.
    if enc.dtype == jnp.float32:
        ctx = jnp.sum(w[:, :, None] * enc, axis=1)                        # (Bt, Enc) f32
    else:
        ctx = jnp.einsum('bqs,bse->bqe',
                         w[:, None, :].astype(enc.dtype), enc,
                         preferred_element_type=jnp.float32)[:, 0, :]     # (Bt, Enc) f32

    # Lane-dense packed store: [ctx | wts | zero pad], last dim multiple of 128.
    pad = out_ref.shape[-1] - (enc_dim + s_pad)
    pieces = [ctx.astype(jnp.float32), w]
    if pad > 0:
        pieces.append(jnp.zeros((bt, pad), jnp.float32))
    out_ref[...] = jnp.concatenate(pieces, axis=-1)


# --------------------------------------------------------------------------
# One-time parameter prep
# --------------------------------------------------------------------------
def prepare_attention_params(attn_w, attn_b, v_w, *, stream_dtype=jnp.bfloat16):
    """Split the concat Linear into decoder/encoder column blocks, pre-transpose,
    zero-pad the output (Ddec) dim to 128 lanes, and cast the weight matrices to
    the streaming dtype.  Bias and v stay f32 (zero in padded lanes).  Call once,
    not per forward."""
    decoder_dim = attn_w.shape[0]
    dp = _round_up(decoder_dim, 128)
    pad = dp - decoder_dim

    wd_t = attn_w[:, :decoder_dim].T                       # (Ddec_in, Ddec_out)
    we_t = attn_w[:, decoder_dim:].T                       # (Enc,     Ddec_out)
    wd_t = jnp.pad(wd_t, ((0, 0), (0, pad))).astype(stream_dtype)   # (Ddec, Dp)
    we_t = jnp.pad(we_t, ((0, 0), (0, pad))).astype(stream_dtype)   # (Enc,  Dp)
    b_row = jnp.pad(attn_b.reshape(1, decoder_dim).astype(jnp.float32),
                    ((0, 0), (0, pad)))                              # (1, Dp)
    v_row = jnp.pad(v_w.reshape(1, decoder_dim).astype(jnp.float32),
                    ((0, 0), (0, pad)))                              # (1, Dp)
    return wd_t, we_t, b_row, v_row


# --------------------------------------------------------------------------
# Tiling heuristics (generation-gated, padding-aware)
# --------------------------------------------------------------------------
def _tpu_hw_config():
    """Returns (vmem_budget_bytes, vmem_limit_bytes, cap_two_steps)."""
    phys_vmem = None
    kind = ""
    try:
        phys_vmem = int(pltpu.get_tpu_info().vmem_capacity_bytes)
    except Exception:
        pass
    try:
        kind = jax.devices()[0].device_kind.lower()
    except Exception:
        pass
    two_tc = ("v7" in kind) or ("7x" in kind)
    small_vmem = (phys_vmem is not None) and (phys_vmem <= 64 * 1024 * 1024)
    if two_tc or small_vmem:
        # v7x-class: 64 MiB physical VMEM, 2 TensorCores -> small scoped footprint,
        # keep >=2 balanced grid steps so both cores get work.
        return 20 * 1024 * 1024, 32 * 1024 * 1024, True
    # v5e / v6e: 1 TensorCore, 128 MiB VMEM -> one fat tile, large scoped limit.
    return 48 * 1024 * 1024, 80 * 1024 * 1024, False


def _choose_batch_tile(s_pad, enc_dim, ddec, dp, stream_dtype, out_width,
                       vmem_budget_bytes):
    """Per-batch-row VMEM bytes with physical (sublane,128-lane) tile padding."""
    isz = jnp.dtype(stream_dtype).itemsize
    sub = 16 if isz < 4 else 8
    enc_lanes = _round_up(enc_dim, 128)
    s_sub = _round_up(s_pad, sub)
    s_sub32 = _round_up(s_pad, 8)
    per_row = (
        2 * s_sub * enc_lanes * isz          # encoder slab, double buffered
        + 2 * _round_up(ddec, 128) * isz     # decoder row, double buffered
        + 2 * out_width * 4                  # packed output, double buffered
        + 2 * s_sub32 * dp * 4               # enc_proj + energy f32 temporaries
        + 4 * _round_up(s_pad, 128) * 4      # scores / exp / weights temporaries
        + 2 * enc_lanes * 4                  # f32 context temporary
    )
    fixed = (2 * (_round_up(ddec, sub) + _round_up(enc_dim, sub)) * dp * isz
             + 4 * 8 * dp * 4                # bias / v blocks (sublane padded)
             + (2 << 20))                    # compiler scratch slack
    bt = (vmem_budget_bytes - fixed) // per_row
    return int(max(1, bt))


def _plan_batch_tiling(B, bt_hint, cap_two_steps):
    """Turn the VMEM-derived hint into a legal (sublane-aligned) tile plan."""
    bt = max(1, min(int(bt_hint), B))
    if cap_two_steps and B > 8:
        bt = min(bt, int(pl.cdiv(B, 2)))     # >=2 steps only where 2 TCs exist
    if bt >= B:
        return B, 1
    bt = max(8, (bt // 8) * 8)               # multi-step tiles must be sublane-aligned
    if bt >= B:
        return B, 1
    n_steps = int(pl.cdiv(B, bt))
    if cap_two_steps and n_steps > 1 and (n_steps % 2):
        # Rebalance so the two TensorCores get (close to) equal step counts.
        bt2 = max(8, _round_up(int(pl.cdiv(B, n_steps + 1)), 8))
        if bt2 < B:
            bt, n_steps = bt2, int(pl.cdiv(B, bt2))
    return bt, n_steps


# --------------------------------------------------------------------------
# Forward wrapper
# --------------------------------------------------------------------------
def attention_forward(decoder_hidden, encoder_outputs, params, *, batch_tile=None):
    """
    decoder_hidden : [B, Ddec]
    encoder_outputs: [B, S, Enc]
    params         : output of prepare_attention_params
    returns (context [B, Enc] f32, attention_weights [B, S] f32)
    """
    wd_t, we_t, b_row, v_row = params
    B, Ddec = decoder_hidden.shape
    _, S, Enc = encoder_outputs.shape
    Dp = wd_t.shape[1]
    stream_dtype = wd_t.dtype

    # Pad S to the f32 sublane multiple so the in-kernel flatten / f32 temps are
    # sublane-aligned; padded positions are masked to -inf before the softmax.
    S_pad = _round_up(max(S, 1), 8)
    out_width = _round_up(Enc + S_pad, 128)   # lane-dense packed output width

    dec_in = decoder_hidden.astype(stream_dtype)
    enc_in = encoder_outputs.astype(stream_dtype)
    if S_pad != S:
        enc_in = jnp.pad(enc_in, ((0, 0), (0, S_pad - S), (0, 0)))

    vmem_budget, vmem_limit, cap_two_steps = _tpu_hw_config()
    if batch_tile is None:
        batch_tile = _choose_batch_tile(S_pad, Enc, Ddec, Dp, stream_dtype,
                                        out_width, vmem_budget)
    bt, n_steps = _plan_batch_tiling(B, batch_tile, cap_two_steps)

    # Pad the batch so the grid tiles evenly; padded rows are zeros and their
    # outputs are sliced off (row-wise softmax keeps them from touching real rows).
    Bp = bt * n_steps
    if Bp != B:
        dec_in = jnp.pad(dec_in, ((0, Bp - B), (0, 0)))
        enc_in = jnp.pad(enc_in, ((0, Bp - B), (0, 0), (0, 0)))

    kernel = functools.partial(_attention_kernel, true_s=S)

    packed = pl.pallas_call(
        kernel,
        out_shape=jax.ShapeDtypeStruct((Bp, out_width), jnp.float32),
        grid_spec=pltpu.PrefetchScalarGridSpec(
            num_scalar_prefetch=0,
            grid=(n_steps,),
            in_specs=[
                pl.BlockSpec((bt, Ddec), lambda b: (b, 0)),        # decoder rows
                pl.BlockSpec((bt, S_pad, Enc), lambda b: (b, 0, 0)),  # encoder slab
                pl.BlockSpec((Ddec, Dp), lambda b: (0, 0)),        # Wd^T (replicated)
                pl.BlockSpec((Enc, Dp), lambda b: (0, 0)),         # We^T (replicated)
                pl.BlockSpec((1, Dp), lambda b: (0, 0)),           # bias row
                pl.BlockSpec((1, Dp), lambda b: (0, 0)),           # v row
            ],
            out_specs=pl.BlockSpec((bt, out_width), lambda b: (b, 0)),
        ),
        compiler_params=pltpu.CompilerParams(
            dimension_semantics=("parallel",),        # megacore-shardable batch axis
            vmem_limit_bytes=int(vmem_limit),
        ),
    )(dec_in, enc_in, wd_t, we_t, b_row, v_row)

    ctx = packed[:B, :Enc]
    wts = packed[:B, Enc:Enc + S]
    return ctx, wts


# --------------------------------------------------------------------------
# Pure-JAX reference (mirrors the PyTorch forward)
# --------------------------------------------------------------------------
def reference_forward(decoder_hidden, encoder_outputs, attn_w, attn_b, v_w,
                      *, context_weight_dtype=jnp.float32):
    """f32 reference mirroring the PyTorch forward.  `context_weight_dtype`
    (default f32 == exact PyTorch semantics) lets the bf16-path test quantize
    the softmax weights the same way the streaming kernel's bf16 context bmm
    does, for an apples-to-apples comparison."""
    B, S, Enc = encoder_outputs.shape
    dec_rep = jnp.repeat(decoder_hidden[:, None, :], S, axis=1)           # (B, S, Ddec)
    cat = jnp.concatenate([dec_rep, encoder_outputs], axis=2)             # (B, S, Ddec+Enc)
    energy = jnp.tanh(cat @ attn_w.T + attn_b)                            # (B, S, Ddec)
    scores = jnp.sum(energy * v_w.reshape(1, 1, -1), axis=-1)             # (B, S)
    weights = jax.nn.softmax(scores, axis=1)                              # (B, S)
    w_c = weights.astype(context_weight_dtype).astype(jnp.float32)
    context = jnp.sum(w_c[:, :, None] * encoder_outputs, axis=1)          # (B, Enc)
    return context, weights


if __name__ == "__main__":
    key = jax.random.PRNGKey(0)
    B, S = 16, 8
    encoder_dim, decoder_dim = 32, 32

    k1, k2, k3, k4, k5 = jax.random.split(key, 5)
    decoder_hidden = jax.random.normal(k1, (B, decoder_dim), dtype=jnp.float32)
    encoder_outputs = jax.random.normal(k2, (B, S, encoder_dim), dtype=jnp.float32)

    # Deterministic parameter init (shapes match nn.Linear in the module).
    fan_in_attn = encoder_dim + decoder_dim
    attn_w = jax.random.uniform(k3, (decoder_dim, fan_in_attn), jnp.float32,
                                -1.0 / jnp.sqrt(fan_in_attn), 1.0 / jnp.sqrt(fan_in_attn))
    attn_b = jax.random.uniform(k4, (decoder_dim,), jnp.float32,
                                -1.0 / jnp.sqrt(fan_in_attn), 1.0 / jnp.sqrt(fan_in_attn))
    v_w = jax.random.uniform(k5, (1, decoder_dim), jnp.float32,
                             -1.0 / jnp.sqrt(decoder_dim), 1.0 / jnp.sqrt(decoder_dim))

    # ---- f32 path (tight correctness check, exact module semantics) ----
    params_f32 = prepare_attention_params(attn_w, attn_b, v_w, stream_dtype=jnp.float32)
    ctx, wts = attention_forward(decoder_hidden, encoder_outputs, params_f32)
    jax.block_until_ready((ctx, wts))
    ctx_ref, wts_ref = reference_forward(decoder_hidden, encoder_outputs, attn_w, attn_b, v_w)
    assert ctx.shape == (B, encoder_dim) and wts.shape == (B, S)
    assert jnp.allclose(ctx, ctx_ref, atol=1e-5, rtol=1e-5)
    assert jnp.allclose(wts, wts_ref, atol=1e-5, rtol=1e-5)

    # ---- bf16-streamed path (memory-bound perf config), compared against a
    # reference run on the same bf16-quantized operands ----
    params_bf16 = prepare_attention_params(attn_w, attn_b, v_w, stream_dtype=jnp.bfloat16)
    ctx_b, wts_b = attention_forward(decoder_hidden, encoder_outputs, params_bf16)
    jax.block_until_ready((ctx_b, wts_b))
    dec_q = decoder_hidden.astype(jnp.bfloat16).astype(jnp.float32)
    enc_q = encoder_outputs.astype(jnp.bfloat16).astype(jnp.float32)
    attn_w_q = attn_w.astype(jnp.bfloat16).astype(jnp.float32)
    ctx_qref, wts_qref = reference_forward(dec_q, enc_q, attn_w_q, attn_b, v_w,
                                           context_weight_dtype=jnp.bfloat16)
    assert jnp.allclose(wts_b, wts_qref, atol=1e-4, rtol=1e-4)
    # Context tolerance is looser only to absorb bf16 rounding-boundary flips of
    # the softmax weights feeding the native bf16 context bmm.
    assert jnp.allclose(ctx_b, ctx_qref, atol=5e-3, rtol=5e-3)

    print("KERNEL_OK")
</pallas_src>

<mosaic_0001>
module attributes {stable_mosaic.version = 11 : i64} {
  func.func @_attention_kernel(%arg0: i32, %arg1: memref<16x32xf32, #tpu.memory_space<vmem>>, %arg2: memref<16x8x32xf32, #tpu.memory_space<vmem>>, %arg3: memref<32x128xf32, #tpu.memory_space<vmem>>, %arg4: memref<32x128xf32, #tpu.memory_space<vmem>>, %arg5: memref<1x128xf32, #tpu.memory_space<vmem>>, %arg6: memref<1x128xf32, #tpu.memory_space<vmem>>, %arg7: memref<16x128xf32, #tpu.memory_space<vmem>>) attributes {dimension_semantics = [#tpu.dimension_semantics<parallel>], iteration_bounds = array<i64: 1>, scalar_prefetch = 0 : i64, scratch_operands = 0 : i64, tpu.core_type = #tpu.core_type<tc>, window_params = [{transform_indices = @transform_0, window_bounds = array<i64: 16, 32>}, {transform_indices = @transform_1, window_bounds = array<i64: 16, 8, 32>}, {pipeline_mode = #tpu.pipeline_mode<synchronous>, transform_indices = @transform_2, window_bounds = array<i64: 32, 128>}, {pipeline_mode = #tpu.pipeline_mode<synchronous>, transform_indices = @transform_3, window_bounds = array<i64: 32, 128>}, {pipeline_mode = #tpu.pipeline_mode<synchronous>, transform_indices = @transform_4, window_bounds = array<i64: 1, 128>}, {pipeline_mode = #tpu.pipeline_mode<synchronous>, transform_indices = @transform_5, window_bounds = array<i64: 1, 128>}, {transform_indices = @transform_6, window_bounds = array<i64: 16, 128>}]} {
    %c0 = arith.constant 0 : index
    %c0_0 = arith.constant 0 : index
    %0 = vector.load %arg1[%c0, %c0_0] : memref<16x32xf32, #tpu.memory_space<vmem>>, vector<16x32xf32>
    %c0_1 = arith.constant 0 : index
    %c0_2 = arith.constant 0 : index
    %c0_3 = arith.constant 0 : index
    %1 = vector.load %arg2[%c0_1, %c0_2, %c0_3] : memref<16x8x32xf32, #tpu.memory_space<vmem>>, vector<16x8x32xf32>
    %c0_4 = arith.constant 0 : index
    %c0_5 = arith.constant 0 : index
    %2 = vector.load %arg5[%c0_4, %c0_5] : memref<1x128xf32, #tpu.memory_space<vmem>>, vector<1x128xf32>
    %c0_6 = arith.constant 0 : index
    %c0_7 = arith.constant 0 : index
    %3 = vector.load %arg6[%c0_6, %c0_7] : memref<1x128xf32, #tpu.memory_space<vmem>>, vector<1x128xf32>
    %c0_8 = arith.constant 0 : index
    %c0_9 = arith.constant 0 : index
    %4 = vector.load %arg3[%c0_8, %c0_9] : memref<32x128xf32, #tpu.memory_space<vmem>>, vector<32x128xf32>
    %cst = arith.constant dense<0.000000e+00> : vector<16x128xf32>
    %5 = tpu.matmul %0, %4, %cst {dimension_numbers = #tpu.dot_dimension_numbers<[1], [0], [0], [1], [0, 0, 1, 1], [], []>} : vector<16x32xf32>, vector<32x128xf32>, vector<16x128xf32> -> vector<16x128xf32>
    %6 = vector.broadcast %2 : vector<1x128xf32> to vector<16x128xf32>
    %7 = arith.addf %5, %6 : vector<16x128xf32>
    %8 = vector.shape_cast %1 : vector<16x8x32xf32> to vector<128x32xf32>
    %c0_10 = arith.constant 0 : index
    %c0_11 = arith.constant 0 : index
    %9 = vector.load %arg4[%c0_10, %c0_11] : memref<32x128xf32, #tpu.memory_space<vmem>>, vector<32x128xf32>
    %cst_12 = arith.constant dense<0.000000e+00> : vector<128x128xf32>
    %10 = tpu.matmul %8, %9, %cst_12 {dimension_numbers = #tpu.dot_dimension_numbers<[1], [0], [0], [1], [0, 0, 1, 1], [], []>} : vector<128x32xf32>, vector<32x128xf32>, vector<128x128xf32> -> vector<128x128xf32>
    %11 = vector.shape_cast %10 : vector<128x128xf32> to vector<16x8x128xf32>
    %12 = vector.shape_cast %7 : vector<16x128xf32> to vector<16x1x128xf32>
    %13 = vector.broadcast %12 : vector<16x1x128xf32> to vector<16x8x128xf32>
    %14 = arith.addf %11, %13 : vector<16x8x128xf32>
    %15 = math.tanh %14 : vector<16x8x128xf32>
    %16 = vector.shape_cast %3 : vector<1x128xf32> to vector<1x1x128xf32>
    %17 = vector.broadcast %16 : vector<1x1x128xf32> to vector<16x8x128xf32>
    %18 = arith.mulf %15, %17 : vector<16x8x128xf32>
    %cst_13 = arith.constant dense<0.000000e+00> : vector<16x8xf32>
    %19 = vector.multi_reduction <add>, %18, %cst_13 [2] : vector<16x8x128xf32> to vector<16x8xf32>
    %cst_14 = arith.constant dense<0xFF800000> : vector<16xf32>
    %20 = vector.multi_reduction <maximumf>, %19, %cst_14 [1] : vector<16x8xf32> to vector<16xf32>
    %21 = vector.shape_cast %20 : vector<16xf32> to vector<16x1xf32>
    %22 = vector.broadcast %21 : vector<16x1xf32> to vector<16x8xf32>
    %23 = arith.subf %19, %22 : vector<16x8xf32>
    %24 = math.exp %23 : vector<16x8xf32>
    %cst_15 = arith.constant dense<0.000000e+00> : vector<16xf32>
    %25 = vector.multi_reduction <add>, %24, %cst_15 [1] : vector<16x8xf32> to vector<16xf32>
    %26 = vector.shape_cast %25 : vector<16xf32> to vector<16x1xf32>
    %27 = vector.broadcast %26 : vector<16x1xf32> to vector<16x8xf32>
    %28 = arith.divf %24, %27 : vector<16x8xf32>
    %29 = vector.shape_cast %28 : vector<16x8xf32> to vector<16x8x1xf32>
    %30 = vector.broadcast %29 : vector<16x8x1xf32> to vector<16x8x32xf32>
    %31 = arith.mulf %30, %1 : vector<16x8x32xf32>
    %cst_16 = arith.constant dense<0.000000e+00> : vector<16x32xf32>
    %32 = vector.multi_reduction <add>, %31, %cst_16 [1] : vector<16x8x32xf32> to vector<16x32xf32>
    %cst_17 = arith.constant 0.000000e+00 : f32
    %33 = vector.broadcast %cst_17 : f32 to vector<16x88xf32>
    %34 = tpu.concatenate %32, %28, %33 in 1 : vector<16x32xf32>, vector<16x8xf32>, vector<16x88xf32> -> vector<16x128xf32>
    %c0_18 = arith.constant 0 : index
    %c0_19 = arith.constant 0 : index
    %35 = vector.load %arg7[%c0_18, %c0_19] : memref<16x128xf32, #tpu.memory_space<vmem>>, vector<16x128xf32>
    tpu.vector_store %arg7[%c0_18, %c0_19], %34 {strides = array<i32>} : memref<16x128xf32, #tpu.memory_space<vmem>>, vector<16x128xf32>,
    return
  }
  func.func @transform_0(%arg0: i32) -> (i32, i32) {
    %c0_i32 = arith.constant 0 : i32
    %c0_i32_0 = arith.constant 0 : i32
    return %arg0, %c0_i32 : i32, i32
  }
  func.func @transform_1(%arg0: i32) -> (i32, i32, i32) {
    %c0_i32 = arith.constant 0 : i32
    %c0_i32_0 = arith.constant 0 : i32
    %c0_i32_1 = arith.constant 0 : i32
    return %arg0, %c0_i32, %c0_i32_0 : i32, i32, i32
  }
  func.func @transform_2(%arg0: i32) -> (i32, i32) {
    %c0_i32 = arith.constant 0 : i32
    %c0_i32_0 = arith.constant 0 : i32
    %c0_i32_1 = arith.constant 0 : i32
    return %c0_i32, %c0_i32_0 : i32, i32
  }
  func.func @transform_3(%arg0: i32) -> (i32, i32) {
    %c0_i32 = arith.constant 0 : i32
    %c0_i32_0 = arith.constant 0 : i32
    %c0_i32_1 = arith.constant 0 : i32
    return %c0_i32, %c0_i32_0 : i32, i32
  }
  func.func @transform_4(%arg0: i32) -> (i32, i32) {
    %c0_i32 = arith.constant 0 : i32
    %c0_i32_0 = arith.constant 0 : i32
    %c0_i32_1 = arith.constant 0 : i32
    return %c0_i32, %c0_i32_0 : i32, i32
  }
  func.func @transform_5(%arg0: i32) -> (i32, i32) {
    %c0_i32 = arith.constant 0 : i32
    %c0_i32_0 = arith.constant 0 : i32
    %c0_i32_1 = arith.constant 0 : i32
    return %c0_i32, %c0_i32_0 : i32, i32
  }
  func.func @transform_6(%arg0: i32) -> (i32, i32) {
    %c0_i32 = arith.constant 0 : i32
    %c0_i32_0 = arith.constant 0 : i32
    return %arg0, %c0_i32 : i32, i32
  }
}

</mosaic_0001>

<bundles_post_ra>
// kernel: tpu_custom_call.1
= control target key start
LH: loop header
LB: loop body
LE: loop exit
PB: predicated region body
PF: predicated region fallthrough
CT: control target
= control target key end

     0   :  { %11 = vsyncpa [#allocation3], 0  ;;  %s2535_s0 = inlined_call_operand.hbm [shape: f32[16,32], index: 0, kind: input, shape index: {}]   ;;  %s2536_s1 = inlined_call_operand.hbm [shape: f32[16,8,32], index: 1, kind: input, shape index: {}]   ;;  %s2537_s2 = inlined_call_operand.hbm [shape: f32[32,128], index: 2, kind: input, shape index: {}]   ;;  %s2538_s3 = inlined_call_operand.hbm [shape: f32[32,128], index: 3, kind: input, shape index: {}]   ;;  %s2539_s4 = inlined_call_operand.hbm [shape: f32[1,128], index: 4, kind: input, shape index: {}]   ;;  %s2540_s5 = inlined_call_operand.hbm [shape: f32[1,128], index: 5, kind: input, shape index: {}]   ;;  %s2541_s6 = inlined_call_operand.hbm [shape: f32[16,128], index: 6, kind: output, shape index: {}]  }
   0x1   :  { %12 = vsyncpa [#allocation6], 0 }
   0x2   :  { %13 = vsyncpa [#allocation9], 0 }
   0x3   :  { %14 = vsyncpa [#allocation12], 0 }
   0x4   :  { %15 = vsyncpa [#allocation4], 0  ;;  %s1923_s21 = smov [#allocation5]   ;;  %s1924_s23 = smov [#allocation8]  }
   0x5   :  { %s33_s22 = sshll.u32 %s1923_s21, 4  ;;  %s57_s24 = sshll.u32 %s1924_s23, 4  ;;  %s34_s22 = int_to_ptr.vmem [resolvable:$true] %s33_s22  ;;  %s1969_s24 = int_to_ptr.vmem [resolvable:$true] %s57_s24 }
   0x6   :  { %s1759_s27 = scalar_lea.hbm %s2536_s1, 2048 }
   0x7   :  { %p1760_p0 = scmp.ne.s32.totalorder %s2536_s1, %s1759_s27  ;;  %p1763_p1 = scmp.lt.u32.totalorder %s1759_s27, %s2536_s1 }
   0x9   :  { %p1765_p2 = pnand %p1763_p1, %p1760_p0 }
   0xb   :  { %1768 = shalt.err (!%p1765_p2)
}
   0xc   :  { %s1769_s8 = scalar_lea.vmem %s34_s22, 2048  ;;  %p1774_p4 = scmp.lt.s32.totalorder %s34_s22, %s34_s22 }
   0xd   :  { %p1770_p3 = scmp.ne.s32.totalorder %s34_s22, %s1769_s8  ;;  %p1775_p5 = scmp.lt.s32.totalorder %s1769_s8, %s1769_s8 }
   0xf   :  { %p1776_p6 = por %p1775_p5, %p1774_p4 }
  0x11   :  { %p1777_p7 = pnand %p1776_p6, %p1770_p3 }
  0x13   :  { %1780 = shalt.err (!%p1777_p7)
}
  0x14   :  { %s1925_s9 = smov 128   ;;  %s1926_s10 = smov 8  }
  0x15   :  { %39 = dma.hbm_to_vmem [thread:$0]  %s2536_s1, 2048, %s34_s22, [#allocation6], %s1925_s9, %s1925_s9, %s1926_s10  }
  0x16   :  { %s1781_s15 = scalar_lea.hbm %s2538_s3, 512 }
  0x17   :  { %p1782_p8 = scmp.ne.s32.totalorder %s2538_s3, %s1781_s15  ;;  %p1785_p9 = scmp.lt.u32.totalorder %s1781_s15, %s2538_s3 }
  0x19   :  { %p1787_p10 = pnand %p1785_p9, %p1782_p8 }
  0x1b   :  { %1790 = shalt.err (!%p1787_p10)
}
  0x1c   :  { %s1791_s20 = scalar_lea.vmem %s1969_s24, 512  ;;  %p1796_p12 = scmp.lt.s32.totalorder %s1969_s24, %s1969_s24 }
  0x1d   :  { %p1792_p11 = scmp.ne.s32.totalorder %s1969_s24, %s1791_s20  ;;  %p1797_p13 = scmp.lt.s32.totalorder %s1791_s20, %s1791_s20 }
  0x1f   :  { %p1798_p0 = por %p1797_p13, %p1796_p12 }
  0x21   :  { %p1799_p1 = pnand %p1798_p0, %p1792_p11 }
  0x23   :  { %1802 = shalt.err (!%p1799_p1)
}
  0x24   :  { %63 = dma.hbm_to_vmem [thread:$0]  %s2538_s3, 512, %s1969_s24, [#allocation9], %s1925_s9, %s1925_s9, %s1926_s10  }
  0x25   :  { %s1927_s22 = smov [#allocation2]   ;;  %s1928_s25 = smov [#allocation7]  }
  0x26   :  { %s21_s23 = sshll.u32 %s1927_s22, 4  ;;  %s45_s26 = sshll.u32 %s1928_s25, 4  ;;  %s22_s23 = int_to_ptr.vmem [resolvable:$true] %s21_s23  ;;  %s2006_s26 = int_to_ptr.vmem [resolvable:$true] %s45_s26 }
  0x27   :  { %s1803_s29 = scalar_lea.hbm %s2535_s0, 256 }
  0x28   :  { %p1804_p2 = scmp.ne.s32.totalorder %s2535_s0, %s1803_s29  ;;  %p1807_p3 = scmp.lt.u32.totalorder %s1803_s29, %s2535_s0 }
  0x2a   :  { %p1809_p4 = pnand %p1807_p3, %p1804_p2 }
  0x2c   :  { %1812 = shalt.err (!%p1809_p4)
}
  0x2d   :  { %s1813_s3 = scalar_lea.vmem %s22_s23, 256  ;;  %p1818_p6 = scmp.lt.s32.totalorder %s22_s23, %s22_s23 }
  0x2e   :  { %p1814_p5 = scmp.ne.s32.totalorder %s22_s23, %s1813_s3  ;;  %p1819_p7 = scmp.lt.s32.totalorder %s1813_s3, %s1813_s3 }
  0x30   :  { %p1820_p8 = por %p1819_p7, %p1818_p6 }
  0x32   :  { %p1821_p9 = pnand %p1820_p8, %p1814_p5 }
  0x34   :  { %1824 = shalt.err (!%p1821_p9)
}
  0x35   :  { %27 = dma.hbm_to_vmem [thread:$0]  %s2535_s0, 256, %s22_s23, [#allocation3], %s1925_s9, %s1925_s9, %s1926_s10  }
  0x36   :  { %s1825_s15 = scalar_lea.hbm %s2537_s2, 512 }
  0x37   :  { %p1826_p10 = scmp.ne.s32.totalorder %s2537_s2, %s1825_s15  ;;  %p1829_p11 = scmp.lt.u32.totalorder %s1825_s15, %s2537_s2 }
  0x39   :  { %p1831_p12 = pnand %p1829_p11, %p1826_p10 }
  0x3b   :  { %1834 = shalt.err (!%p1831_p12)
}
  0x3c   :  { %s1835_s20 = scalar_lea.vmem %s2006_s26, 512  ;;  %p1840_p0 = scmp.lt.s32.totalorder %s2006_s26, %s2006_s26 }
  0x3d   :  { %p1836_p13 = scmp.ne.s32.totalorder %s2006_s26, %s1835_s20  ;;  %p1841_p1 = scmp.lt.s32.totalorder %s1835_s20, %s1835_s20 }
  0x3f   :  { %p1842_p2 = por %p1841_p1, %p1840_p0 }
  0x41   :  { %p1843_p3 = pnand %p1842_p2, %p1836_p13 }
  0x43   :  { %1846 = shalt.err (!%p1843_p3)
}
  0x44   :  { %51 = dma.hbm_to_vmem [thread:$0]  %s2537_s2, 512, %s2006_s26, [#allocation6], %s1925_s9, %s1925_s9, %s1926_s10  }
  0x45   :  { %s1929_s21 = smov [#allocation10]   ;;  %s1930_s23 = smov [#allocation11]  }
  0x46   :  { %s70_s22 = sshll.u32 %s1929_s21, 4  ;;  %s80_s25 = sshll.u32 %s1930_s23, 4  ;;  %s71_s22 = int_to_ptr.vmem [resolvable:$true] %s70_s22  ;;  %s81_s25 = int_to_ptr.vmem [resolvable:$true] %s80_s25 }
  0x47   :  { %s1847_s29 = scalar_lea.hbm %s2539_s4, 16 }
  0x48   :  { %p1848_p4 = scmp.ne.s32.totalorder %s2539_s4, %s1847_s29  ;;  %p1851_p5 = scmp.lt.u32.totalorder %s1847_s29, %s2539_s4 }
  0x4a   :  { %p1853_p6 = pnand %p1851_p5, %p1848_p4 }
  0x4c   :  { %1856 = shalt.err (!%p1853_p6)
}
  0x4d   :  { %s1857_s2 = scalar_lea.vmem %s71_s22, 16  ;;  %s1861_s26 = scalar_lea.vmem %s71_s22, 32 }
  0x4e   :  { %p1858_p7 = scmp.ne.s32.totalorder %s71_s22, %s1857_s2  ;;  %p1862_p8 = scmp.lt.s32.totalorder %s71_s22, %s71_s22 }
  0x4f   :  { %p1863_p9 = scmp.lt.s32.totalorder %s1861_s26, %s1857_s2 }
  0x51   :  { %p1864_p10 = por %p1863_p9, %p1862_p8 }
  0x53   :  { %p1865_p11 = pnand %p1864_p10, %p1858_p7 }
  0x55   :  { %1868 = shalt.err (!%p1865_p11)
}
  0x56   :  { %73 = dma.hbm_to_vmem [thread:$0]  %s2539_s4, 16, %s71_s22, [#allocation9]  }
  0x57   :  { %s1869_s14 = scalar_lea.hbm %s2540_s5, 16 }
  0x58   :  { %p1870_p12 = scmp.ne.s32.totalorder %s2540_s5, %s1869_s14  ;;  %p1873_p13 = scmp.lt.u32.totalorder %s1869_s14, %s2540_s5 }
  0x5a   :  { %p1875_p0 = pnand %p1873_p13, %p1870_p12 }
  0x5c   :  { %1878 = shalt.err (!%p1875_p0)
}
  0x5d   :  { %s1879_s19 = scalar_lea.vmem %s81_s25, 16  ;;  %s1883_s20 = scalar_lea.vmem %s81_s25, 32 }
  0x5e   :  { %p1880_p1 = scmp.ne.s32.totalorder %s81_s25, %s1879_s19  ;;  %p1884_p2 = scmp.lt.s32.totalorder %s81_s25, %s81_s25 }
  0x5f   :  { %p1885_p3 = scmp.lt.s32.totalorder %s1883_s20, %s1879_s19 }
  0x61   :  { %p1886_p4 = por %p1885_p3, %p1884_p2 }
  0x63   :  { %p1887_p5 = pnand %p1886_p4, %p1880_p1 }
  0x65   :  { %1890 = shalt.err (!%p1887_p5)
}
  0x66   :  { %83 = dma.hbm_to_vmem [thread:$0]  %s2540_s5, 16, %s81_s25, [#allocation12]  }
  0x67   :  { %1913 = dma.done.wait [#allocation3], 256  }
  0x68   :  { %1914 = vsyncadd [#allocation3], 4294967040 }
  0x69   :  { %1915 = dma.done.wait [#allocation6], 2560  }
  0x6a   :  { %1916 = vsyncadd [#allocation6], 4294964736 }
  0x6b   :  { %1917 = dma.done.wait [#allocation9], 528  }
  0x6c   :  { %1918 = vsyncadd [#allocation9], 4294966768 }
  0x6d   :  { %1919 = dma.done.wait [#allocation12], 16  }
  0x6e   :  { %1920 = vsyncadd [#allocation12], 4294967280  ;;  %v122_v0 = vld [vmem:[#allocation7] sm:$0xff]  ;;  %v123_v1 = vld [vmem:[#allocation7 + $0x8] sm:$0xff]  ;;  %vm132_vm0 = vcmask 261120   ;;  %v417_v32 = vlaneseq  ;;  %vm759_vm1 = vcmask 1041409  }
  0x6f   :  { %v214_v2 = vld [vmem:[#allocation8] sm:$0xff]  ;;  %v1620_v3 = vpack.c.bf16 %v123_v1, %v122_v0  ;;  %v215_v4 = vld [vmem:[#allocation8 + $0x8] sm:$0xff]  ;;  %v124_v5 = vld [vmem:[#allocation7 + $0x10] sm:$0xff]  ;;  %v1931_v30 = vmov 1966171168   ;;  %vm761_vm2 = vcmask 1042434  }
  0x70   :  { %v125_v6 = vld [vmem:[#allocation7 + $0x18] sm:$0xff]  ;;  %v1628_v7 = vpack.c.bf16 %v215_v4, %v214_v2  ;;  %v216_v9 = vld [vmem:[#allocation8 + $0x10] sm:$0xff]  ;;  %v2069_v16 = vld [vmem:[#allocation5 + $0x40] sm:$0xff]  ;;  %v415_v31 = vunpack.c.l.s4 %v1931_v30  ;;  %v2104_v34 = vshrl.u32 %v417_v32, 7  ;;  %vm763_vm3 = vcmask 1043459   ;;  %s1933_s5 = smov [#allocation13]  }
  0x71   :  { %v1624_v8 = vpack.c.bf16 %v125_v6, %v124_v5  ;;  %v217_v10 = vld [vmem:[#allocation8 + $0x18] sm:$0xff]  ;;  %v102_v11 = vld [vmem:[#allocation2] sm:$0xff]  ;;  %1621 = vmatprep.subr.bf16.mxu0 %v1620_v3  ;;  %v104_v17 = vld [vmem:[#allocation5] sm:$0xff]  ;;  %vm765_vm4 = vcmask 1044484   ;;  %vm767_vm5 = vcmask 1045509   ;;  %vm769_vm6 = vcmask 1046534  }
  0x72   :  { %v1632_v12 = vpack.c.bf16 %v217_v10, %v216_v9  ;;  %1585 = vmatprep.mubr.msk.f32.mxu0 %vm132_vm0, %v102_v11  ;;  %v110_v13 = vld [vmem:[#allocation5 + $0x30] sm:$0xff]  ;;  %1636 = vmatprep.subr.bf16.mxu1 %v1628_v7  ;;  %v103_v14 = vld [vmem:[#allocation2 + $0x8] sm:$0xff]  ;;  %v2075_v18 = vld [vmem:[#allocation5 + $0x48] sm:$0xff]  ;;  %v416_v33 = vunpack.c.0.s8 %v415_v31  ;;  %v2108_v45 = vsub.s32 0, %v2104_v34  ;;  %vm771_vm7 = vcmask 1047559   ;;  %s1516_s1 = sshll.u32 %s1933_s5, 4  ;;  %s1517_s1 = int_to_ptr.vmem [resolvable:$true] %s1516_s1 }
  0x73   :  { %1623 = vmatpush3.bf16.msra.mxu0 %v1620_v3  ;;  %1638 = vmatpush3.bf16.msra.mxu1 %v1628_v7  ;;  %v111_v15 = vld [vmem:[#allocation5 + $0x38] sm:$0xff]  ;;  %v2078_v19 = vld [vmem:[#allocation5 + $0x50] sm:$0xff]  ;;  %v105_v20 = vld [vmem:[#allocation5 + $0x8] sm:$0xff]  ;;  %vm782_vm8 = vcmask 64512   ;;  %vm1506_vm9 = vcmask 326656   ;;  %s1891_s21 = scalar_lea.vmem %s1517_s1, 256  ;;  %p1896_p7 = scmp.lt.s32.totalorder %s1517_s1, %s1517_s1 }
  0x74   :  { %1625 = vmatprep.subr.bf16.mxu0 %v1624_v8  ;;  %1637 = vmatprep.subr.bf16.mxu1 %v1632_v12  ;;  %v2084_v21 = vld [vmem:[#allocation5 + $0x58] sm:$0xff]  ;;  %v106_v22 = vld [vmem:[#allocation5 + $0x10] sm:$0xff]  ;;  %v2086_v23 = vld [vmem:[#allocation5 + $0x60] sm:$0xff]  ;;  %v419_v36 = vsub.s32 %v416_v33, %v2104_v34  ;;  %p1892_p6 = scmp.ne.s32.totalorder %s1517_s1, %s1891_s21  ;;  %p1897_p8 = scmp.lt.s32.totalorder %s1891_s21, %s1891_s21 }
  0x75   :  { %1605 = vmatprep.mubr.msk.f32.mxu1 %vm132_vm0, %v110_v13  ;;  %v107_v24 = vld [vmem:[#allocation5 + $0x18] sm:$0xff]  ;;  %v2094_v25 = vld [vmem:[#allocation5 + $0x68] sm:$0xff]  ;;  %v108_v26 = vld [vmem:[#allocation5 + $0x20] sm:$0xff] }
  0x76   :  { %v118_v27 = vld [vmem:[#allocation5 + $0x70] sm:$0xff]  ;;  %v109_v28 = vld [vmem:[#allocation5 + $0x28] sm:$0xff]  ;;  %v119_v29 = vld [vmem:[#allocation5 + $0x78] sm:$0xff]  ;;  %p1898_p9 = por %p1897_p8, %p1896_p7 }
  0x77   :  { %1627 = vmatpush3.bf16.msra.mxu0 %v1624_v8  ;;  %1639 = vmatpush3.bf16.msra.mxu1 %v1632_v12  ;;  %v1531_v35 = vld [vmem:[#allocation10] ss:$0 sm:$0xff] }
  0x78   :  { %1629 = vmatprep.subr.bf16.mxu0 %v1628_v7  ;;  %p1899_p10 = pnand %p1898_p9, %p1892_p6 }
  0x7a   :  { %1586 = vmatmul.mubr.msk.f32.vlgmr.msra.gmra.mrb[0].mxu0 %vm132_vm0, %v103_v14  ;;  %1606 = vmatmul.mubr.msk.f32.vlgmr.msra.gmra.mrb[0].mxu1 %vm132_vm0, %v111_v15 }
  0x7b   :  { %1631 = vmatpush3.bf16.msra.mxu0 %v1628_v7  ;;  %1608 = vmatprep.mubr.msk.f32.mxu1 %vm132_vm0, %v2069_v16 }
  0x7c   :  { %1633 = vmatprep.subr.bf16.mxu0 %v1632_v12  ;;  %1596 = vmatprep.mubr.msk.f32.mxu0 %vm132_vm0, %v104_v17 }
  0x7e   :  { %1609 = vmatmul.mubr.msk.f32.gmra.mrb[2].mxu1 %vm132_vm0, %v2075_v18 }
  0x7f   :  { %1635 = vmatpush3.bf16.msra.mxu0 %v1632_v12  ;;  %1611 = vmatprep.mubr.msk.f32.mxu1 %vm132_vm0, %v2078_v19 }
  0x82   :  { %1597 = vmatmul.mubr.msk.f32.vlgmr.msra.gmra.mrb[2].mxu0 %vm132_vm0, %v105_v20  ;;  %1612 = vmatmul.mubr.msk.f32.gmra.mrb[4].mxu1 %vm132_vm0, %v2084_v21 }
  0x83   :  { %1599 = vmatprep.mubr.msk.f32.mxu0 %vm132_vm0, %v106_v22  ;;  %1614 = vmatprep.mubr.msk.f32.mxu1 %vm132_vm0, %v2086_v23 }
  0x86   :  { %1600 = vmatmul.mubr.msk.f32.gmra.mrb[4].mxu0 %vm132_vm0, %v107_v24  ;;  %1615 = vmatmul.mubr.msk.f32.gmra.mrb[6].mxu1 %vm132_vm0, %v2094_v25 }
  0x87   :  { %1602 = vmatprep.mubr.msk.f32.mxu0 %vm132_vm0, %v108_v26  ;;  %1617 = vmatprep.mubr.msk.f32.mxu1 %vm132_vm0, %v118_v27 }
  0x8a   :  { %1603 = vmatmul.mubr.msk.f32.gmra.mrb[6].mxu0 %vm132_vm0, %v109_v28  ;;  %1618 = vmatmul.mubr.msk.f32.gmra.mrb[8].mxu1 %vm132_vm0, %v119_v29 }
 0x14d   :  { %v1587_v37 = vpop.f32.mrb[0].mxu0  ;;  %v1607_v40 = vpop.f32.mrb[0].mxu1 }
 0x14e   :  { %v211_v38 = vadd.f32 %v1587_v37, %v1531_v35  ;;  %v205_v39 = vpop.f32.mrb[1].mxu0  ;;  %v362_v42 = vpop.f32.mrb[1].mxu1 }
 0x14f   :  { %v206_v41 = vadd.f32 %v1531_v35, %v205_v39 }
 0x150   :  { %v462_v43 = vcombine.high %v211_v38, %v211_v38  ;;  %v469_v44 = vrot.slane %v211_v38, %v419_v36 }
 0x151   :  { %v413_v46 = vcombine.high %v206_v41, %v206_v41  ;;  %v420_v47 = vrot.slane %v206_v41, %v419_v36  ;;  %v1610_v50 = vpop.f32.mrb[2].mxu1 }
 0x152   :  { %v476_v48 = vrot.slane %v462_v43, %v419_v36  ;;  %v477_v49 = vcombine.high %v469_v44, %v469_v44  ;;  %v485_v51 = vrot.slane %v469_v44, %v419_v36  ;;  %v372_v54 = vpop.f32.mrb[3].mxu1 }
 0x153   :  { %v427_v52 = vrot.slane %v413_v46, %v419_v36  ;;  %v428_v53 = vcombine.high %v420_v47, %v420_v47  ;;  %v436_v55 = vrot.slane %v420_v47, %v419_v36 }
 0x154   :  { %v499_v56 = vrot.slane %v477_v49, %v419_v36  ;;  %v546_v57 = vrot.slane %v485_v51, %v2108_v45  ;;  %v507_v58 = vcombine.high %v485_v51, %v485_v51  ;;  %v478_v59 = vcombine.high %v476_v48, %v476_v48 }
 0x155   :  { %v429_v60 = vcombine.high %v427_v52, %v427_v52  ;;  %v443_v61 = vrot.slane %v427_v52, %v419_v36  ;;  %v1598_v62 = vpop.f32.mrb[2].mxu0  ;;  %v450_v63 = vrot.slane %v428_v53, %v419_v36  ;;  %v514_v0 = vrot.slane %v436_v55, %v2108_v45  ;;  %v1613_v4 = vpop.f32.mrb[4].mxu1 }
 0x156   :  { %v550_v1 = vrot.slane %v499_v56, %v2108_v45  ;;  %v599_v2 = vadd.f32 %v546_v57, %v372_v54  ;;  %v332_v3 = vpop.f32.mrb[3].mxu0  ;;  %v509_v5 = vcombine.high %v499_v56, %v499_v56  ;;  %v554_v6 = vrot.slane %v507_v58, %v2108_v45  ;;  %v382_v11 = vpop.f32.mrb[5].mxu1 }
 0x157   :  { %v457_v7 = vrot.slane %v429_v60, %v419_v36  ;;  %v459_v8 = vcombine.high %v443_v61, %v443_v61  ;;  %v518_v9 = vrot.slane %v450_v63, %v2108_v45  ;;  %v591_v10 = vadd.f32 %v514_v0, %v332_v3 }
 0x158   :  { %v600_v12 = vadd.f32 %v1610_v50, %v550_v1  ;;  %1653 = vtanh.f32 %v599_v2  ;;  %v558_v13 = vrot.slane %v509_v5, %v2108_v45  ;;  %v601_v14 = vadd.f32 %v554_v6, %v382_v11 }
 0x159   :  { %v461_v15 = vcombine.high %v457_v7, %v457_v7  ;;  %v538_v17 = vrot.slane %v459_v8, %v2108_v45  ;;  %v592_v20 = vadd.f32 %v1598_v62, %v518_v9  ;;  %1655 = vtanh.f32 %v591_v10  ;;  %v1601_v22 = vpop.f32.mrb[4].mxu0  ;;  %v1616_v27 = vpop.f32.mrb[6].mxu1 }
 0x15a   :  { %1657 = vtanh.f32 %v600_v12  ;;  %v602_v24 = vadd.f32 %v1613_v4, %v558_v13  ;;  %v460_v26 = vcombine.high %v450_v63, %v450_v63  ;;  %v506_v28 = vrot.slane %v478_v59, %v419_v36  ;;  %v342_v29 = vpop.f32.mrb[5].mxu0  ;;  %v392_v35 = vpop.f32.mrb[7].mxu1 }
 0x15b   :  { %v542_v30 = vrot.slane %v461_v15, %v2108_v45  ;;  %v597_v31 = vadd.f32 %v538_v17, %v362_v42  ;;  %1659 = vtanh.f32 %v592_v20  ;;  %v458_v33 = vcombine.high %v436_v55, %v436_v55 }
 0x15c   :  { %v526_v37 = vrot.slane %v460_v26, %v2108_v45  ;;  %v566_v38 = vrot.slane %v506_v28, %v2108_v45  ;;  %v492_v39 = vrot.slane %v476_v48, %v419_v36  ;;  %v534_v46 = vrot.slane %v457_v7, %v2108_v45  ;;  %v2124_v48 = vld [vmem:[#allocation11] ss:$0 sm:$0xff] }
 0x15d   :  { %v598_v41 = vadd.f32 %v1607_v40, %v542_v30  ;;  %v522_v43 = vrot.slane %v458_v33, %v2108_v45  ;;  %v1604_v44 = vpop.f32.mrb[6].mxu0  ;;  %1661 = vtanh.f32 %v601_v14  ;;  %v1619_v42 = vpop.f32.mrb[8].mxu1  ;;  %v510_v54 = vcombine.high %v506_v28, %v506_v28 }
 0x15e   :  { %v594_v47 = vadd.f32 %v1601_v22, %v526_v37  ;;  %v604_v49 = vadd.f32 %v1616_v27, %v566_v38  ;;  %v562_v50 = vrot.slane %v492_v39, %v2108_v45  ;;  %v352_v51 = vpop.f32.mrb[7].mxu0  ;;  %v596_v53 = vadd.f32 %v1604_v44, %v534_v46  ;;  %v402_v55 = vpop.f32.mrb[9].mxu1 }
 0x15f   :  { %v593_v52 = vadd.f32 %v522_v43, %v342_v29  ;;  %v530_v36 = vrot.slane %v443_v61, %v2108_v45  ;;  %v508_v40 = vcombine.high %v492_v39, %v492_v39  ;;  %1663 = vtanh.f32 %v602_v24 }
 0x160   :  { %v603_v56 = vadd.f32 %v562_v50, %v392_v35  ;;  %v574_v57 = vrot.slane %v510_v54, %v2108_v45  ;;  %v2159_v50 = vand.u32 127, %v417_v32 }
 0x161   :  { %1665 = vtanh.f32 %v593_v52  ;;  %v595_v59 = vadd.f32 %v530_v36, %v352_v51  ;;  %v570_v60 = vrot.slane %v508_v40, %v2108_v45 }
 0x162   :  { %v1654_v58 = vpop.eup %1653  ;;  %v606_v63 = vadd.f32 %v1619_v42, %v574_v57  ;;  %1667 = vtanh.f32 %v594_v47  ;;  %v2167_v52 = vsub.s32 %v2159_v50, %v2104_v34 }
 0x163   :  { %v1656_v62 = vpop.eup %1655  ;;  %v637_v0 = vmul.f32 %v1654_v58, %v2124_v48  ;;  %v605_v2 = vadd.f32 %v570_v60, %v402_v55  ;;  %1669 = vtanh.f32 %v604_v49 }
 0x164   :  { %v1658_v1 = vpop.eup %1657  ;;  %v629_v61 = vmul.f32 %v1656_v62, %v2124_v48  ;;  %1671 = vtanh.f32 %v597_v31 }
 0x165   :  { %v1660_v3 = vpop.eup %1659  ;;  %661 = vadd.xlane.f32.xlu1 %v637_v0  ;;  %v638_v4 = vmul.f32 %v1658_v1, %v2124_v48  ;;  %1673 = vtanh.f32 %v603_v56 }
 0x166   :  { %645 = vadd.xlane.f32.xlu0 %v629_v61  ;;  %v630_v6 = vmul.f32 %v1660_v3, %v2124_v48  ;;  %1675 = vtanh.f32 %v596_v53 }
 0x167   :  { %v1662_v5 = vpop.eup %1661  ;;  %1677 = vtanh.f32 %v605_v2 }
 0x168   :  { %v639_v8 = vmul.f32 %v1662_v5, %v2124_v48  ;;  %1679 = vtanh.f32 %v595_v59 }
 0x169   :  { %663 = vadd.xlane.f32.xlu1 %v638_v4  ;;  %v1664_v7 = vpop.eup %1663  ;;  %1681 = vtanh.f32 %v606_v63 }
 0x16a   :  { %647 = vadd.xlane.f32.xlu0 %v630_v6  ;;  %v640_v12 = vmul.f32 %v1664_v7, %v2124_v48  ;;  %1683 = vtanh.f32 %v598_v41 }
 0x16b   :  { %v1666_v9 = vpop.eup %1665 }
 0x16c   :  { %v631_v10 = vmul.f32 %v1666_v9, %v2124_v48  ;;  %v1668_v11 = vpop.eup %1667 }
 0x16d   :  { %665 = vadd.xlane.f32.xlu1 %v639_v8  ;;  %v1670_v13 = vpop.eup %1669  ;;  %v632_v14 = vmul.f32 %v1668_v11, %v2124_v48 }
 0x16e   :  { %649 = vadd.xlane.f32.xlu0 %v631_v10  ;;  %v1672_v15 = vpop.eup %1671  ;;  %v642_v17 = vmul.f32 %v1670_v13, %v2124_v48 }
 0x16f   :  { %v1674_v20 = vpop.eup %1673  ;;  %v635_v22 = vmul.f32 %v1672_v15, %v2124_v48 }
 0x170   :  { %v1676_v24 = vpop.eup %1675  ;;  %v641_v26 = vmul.f32 %v1674_v20, %v2124_v48 }
 0x171   :  { %667 = vadd.xlane.f32.xlu1 %v640_v12  ;;  %v1678_v27 = vpop.eup %1677  ;;  %v634_v28 = vmul.f32 %v1676_v24, %v2124_v48 }
 0x172   :  { %651 = vadd.xlane.f32.xlu0 %v632_v14  ;;  %v1680_v29 = vpop.eup %1679  ;;  %v643_v30 = vmul.f32 %v1678_v27, %v2124_v48 }
 0x173   :  { %v1682_v31 = vpop.eup %1681  ;;  %v633_v33 = vmul.f32 %v1680_v29, %v2124_v48 }
 0x174   :  { %v1684_v35 = vpop.eup %1683  ;;  %v644_v37 = vmul.f32 %v1682_v31, %v2124_v48  ;;  %v2229_v31 = vsub.s32 1, %v2104_v34 }
 0x175   :  { %671 = vadd.xlane.f32.xlu1 %v642_v17  ;;  %v636_v38 = vmul.f32 %v1684_v35, %v2124_v48  ;;  %v2235_v35 = vsub.s32 4, %v2104_v34 }
 0x176   :  { %657 = vadd.xlane.f32.xlu0 %v635_v22 }
 0x179   :  { %669 = vadd.xlane.f32.xlu1 %v641_v26 }
 0x17a   :  { %655 = vadd.xlane.f32.xlu0 %v634_v28 }
 0x17d   :  { %673 = vadd.xlane.f32.xlu1 %v643_v30  ;;  %v1932_v30 = vmov 0  }
 0x17e   :  { %653 = vadd.xlane.f32.xlu0 %v633_v33  ;;  %1651 = vset.pattern.permute.xlu1 %v1932_v30  ;;  %v2232_v33 = vsub.s32 2, %v2104_v34 }
 0x17f   :  { %1652 = vset.pattern.permute.xlu0 %v1932_v30 }
 0x181   :  { %675 = vadd.xlane.f32.xlu1 %v644_v37  ;;  %v2238_v37 = vsub.s32 5, %v2104_v34 }
 0x182   :  { %659 = vadd.xlane.f32.xlu0 %v636_v38 }
 0x1f2   :  { %v2144_v39 = vpop.xlane.xlu1 %661 }
 0x1f3   :  { %v2146_v41 = vpop.xlane.xlu0 %645  ;;  %v730_v32 = vrot.slane %v2144_v39, %v2167_v52 }
 0x1f4   :  { %v698_v60 = vrot.slane %v2146_v41, %v2167_v52 }
 0x1f6   :  { %v2148_v43 = vpop.xlane.xlu1 %663 }
 0x1f7   :  { %v2150_v44 = vpop.xlane.xlu0 %647  ;;  %v734_v54 = vrot.slane %v2148_v43, %v2167_v52 }
 0x1f8   :  { %v702_v40 = vrot.slane %v2150_v44, %v2167_v52 }
 0x1f9   :  { %v773_v58 = vsel %vm759_vm1, %v734_v54, %v730_v32  ;;  %v2243_v32 = vsub.s32 3, %v2104_v34 }
 0x1fa   :  { %v2152_v46 = vpop.xlane.xlu1 %665  ;;  %v760_v2 = vsel %vm759_vm1, %v702_v40, %v698_v60 }
 0x1fb   :  { %v2154_v47 = vpop.xlane.xlu0 %649  ;;  %v738_v55 = vrot.slane %v2152_v46, %v2167_v52 }
 0x1fc   :  { %v706_v59 = vrot.slane %v2154_v47, %v2167_v52 }
 0x1fd   :  { %v774_v62 = vsel %vm761_vm2, %v738_v55, %v773_v58 }
 0x1fe   :  { %v2156_v49 = vpop.xlane.xlu1 %667  ;;  %v762_v5 = vsel %vm761_vm2, %v706_v59, %v760_v2 }
 0x1ff   :  { %v2161_v42 = vpop.xlane.xlu0 %651  ;;  %v742_v36 = vrot.slane %v2156_v49, %v2167_v52 }
 0x200   :  { %v710_v63 = vrot.slane %v2161_v42, %v2167_v52 }
 0x201   :  { %v775_v1 = vsel %vm763_vm3, %v742_v36, %v774_v62 }
 0x202   :  { %v2163_v51 = vpop.xlane.xlu1 %671  ;;  %v764_v8 = vsel %vm763_vm3, %v710_v63, %v762_v5 }
 0x203   :  { %v2169_v53 = vpop.xlane.xlu0 %657  ;;  %v750_v6 = vrot.slane %v2163_v51, %v2167_v52 }
 0x204   :  { %v722_v11 = vrot.slane %v2169_v53, %v2167_v52 }
 0x206   :  { %v670_v56 = vpop.xlane.xlu1 %669 }
 0x207   :  { %v746_v48 = vrot.slane %v670_v56, %v2167_v52  ;;  %v2182_v57 = vpop.xlane.xlu0 %655 }
 0x208   :  { %v718_v9 = vrot.slane %v2182_v57, %v2167_v52 }
 0x209   :  { %v776_v61 = vsel %vm765_vm4, %v746_v48, %v775_v1  ;;  %v2253_v1 = vsub.s32 6, %v2104_v34 }
 0x20a   :  { %v2192_v0 = vpop.xlane.xlu1 %673  ;;  %v777_v14 = vsel %vm767_vm5, %v750_v6, %v776_v61 }
 0x20b   :  { %v754_v3 = vrot.slane %v2192_v0, %v2167_v52  ;;  %v2199_v4 = vpop.xlane.xlu0 %653 }
 0x20c   :  { %v714_v7 = vrot.slane %v2199_v4, %v2167_v52 }
 0x20d   :  { %v778_v17 = vsel %vm769_vm6, %v754_v3, %v777_v14 }
 0x20e   :  { %v2209_v10 = vpop.xlane.xlu1 %675  ;;  %v766_v12 = vsel %vm765_vm4, %v714_v7, %v764_v8 }
 0x20f   :  { %v758_v13 = vrot.slane %v2209_v10, %v2167_v52  ;;  %v2217_v15 = vpop.xlane.xlu0 %659  ;;  %v768_v20 = vsel %vm767_vm5, %v718_v9, %v766_v12 }
 0x210   :  { %v726_v22 = vrot.slane %v2217_v15, %v2167_v52  ;;  %v770_v26 = vsel %vm769_vm6, %v722_v11, %v768_v20 }
 0x211   :  { %v779_v24 = vsel %vm771_vm7, %v758_v13, %v778_v17 }
 0x212   :  { %v786_v27 = vsel %vm782_vm8, %v779_v24, -inf  ;;  %v772_v28 = vsel %vm771_vm7, %v726_v22, %v770_v26 }
 0x213   :  { %787 = vmax.xlane.f32.xlu1 %v786_v27  ;;  %v783_v29 = vsel %vm782_vm8, %v772_v28, -inf }
 0x214   :  { %784 = vmax.xlane.f32.xlu0 %v783_v29 }
 0x2a0   :  { %v788_v38 = vpop.xlane.xlu1 %787 }
 0x2a1   :  { %v826_v54 = vrot.slane %v788_v38, %v2108_v45  ;;  %v830_v55 = vrot.slane %v788_v38, %v2229_v31  ;;  %v834_v36 = vrot.slane %v788_v38, %v2232_v33  ;;  %v842_v40 = vrot.slane %v788_v38, %v2235_v35  ;;  %v2250_v62 = vpop.xlane.xlu0 %784 }
 0x2a2   :  { %v846_v48 = vrot.slane %v788_v38, %v2238_v37  ;;  %v838_v2 = vrot.slane %v788_v38, %v2243_v32  ;;  %v802_v14 = vrot.slane %v2250_v62, %v2232_v33 }
 0x2a3   :  { %v879_v58 = vsub.f32 %v2144_v39, %v826_v54  ;;  %v880_v59 = vsub.f32 %v2148_v43, %v830_v55  ;;  %v883_v60 = vsub.f32 %v670_v56, %v842_v40  ;;  %v881_v61 = vsub.f32 %v2152_v46, %v834_v36 }
 0x2a4   :  { %v884_v5 = vsub.f32 %v2163_v51, %v846_v48  ;;  %v794_v39 = vrot.slane %v2250_v62, %v2108_v45  ;;  %v2261_v43 = vsub.s32 7, %v2104_v34  ;;  %v850_v56 = vrot.slane %v788_v38, %v2253_v1 }
 0x2a5   :  { %v903_v63 = vmul.f32 1.442695, %v879_v58  ;;  %v905_v3 = vmul.f32 1.442695, %v880_v59  ;;  %v911_v6 = vmul.f32 1.442695, %v883_v60  ;;  %v882_v7 = vsub.f32 %v2156_v49, %v838_v2 }
 0x2a6   :  { %v907_v8 = vmul.f32 1.442695, %v881_v61  ;;  %v913_v9 = vmul.f32 1.442695, %v884_v5  ;;  %v798_v46 = vrot.slane %v2250_v62, %v2229_v31  ;;  %v871_v51 = vsub.f32 %v2146_v41, %v794_v39 }
 0x2a7   :  { %1685 = vpow2.f32 %v903_v63  ;;  %v854_v11 = vrot.slane %v788_v38, %v2261_v43  ;;  %v885_v12 = vsub.f32 %v2192_v0, %v850_v56  ;;  %v909_v13 = vmul.f32 1.442695, %v882_v7 }
 0x2a8   :  { %1687 = vpow2.f32 %v905_v3  ;;  %v872_v49 = vsub.f32 %v2150_v44, %v798_v46  ;;  %v887_v17 = vmul.f32 1.442695, %v871_v51  ;;  %v806_v41 = vrot.slane %v2250_v62, %v2243_v32 }
 0x2a9   :  { %1689 = vpow2.f32 %v911_v6  ;;  %v886_v22 = vsub.f32 %v2209_v10, %v854_v11  ;;  %v915_v24 = vmul.f32 1.442695, %v885_v12  ;;  %v873_v0 = vsub.f32 %v2154_v47, %v802_v14 }
 0x2aa   :  { %1691 = vpow2.f32 %v907_v8  ;;  %v889_v26 = vmul.f32 1.442695, %v872_v49  ;;  %v810_v10 = vrot.slane %v2250_v62, %v2235_v35  ;;  %v874_v29 = vsub.f32 %v2161_v42, %v806_v41 }
 0x2ab   :  { %1693 = vpow2.f32 %v913_v9  ;;  %v917_v44 = vmul.f32 1.442695, %v886_v22  ;;  %v891_v30 = vmul.f32 1.442695, %v873_v0  ;;  %v814_v54 = vrot.slane %v2250_v62, %v2238_v37 }
 0x2ac   :  { %1695 = vpow2.f32 %v909_v13  ;;  %v875_v55 = vsub.f32 %v2199_v4, %v810_v10  ;;  %v893_v36 = vmul.f32 1.442695, %v874_v29  ;;  %v818_v48 = vrot.slane %v2250_v62, %v2253_v1 }
 0x2ad   :  { %1697 = vpow2.f32 %v887_v17  ;;  %v876_v58 = vsub.f32 %v2182_v57, %v814_v54  ;;  %v822_v63 = vrot.slane %v2250_v62, %v2261_v43 }
 0x2ae   :  { %1699 = vpow2.f32 %v915_v24  ;;  %v895_v59 = vmul.f32 1.442695, %v875_v55  ;;  %v877_v2 = vsub.f32 %v2169_v53, %v818_v48 }
 0x2af   :  { %1701 = vpow2.f32 %v889_v26  ;;  %v897_v61 = vmul.f32 1.442695, %v876_v58  ;;  %v878_v5 = vsub.f32 %v2217_v15, %v822_v63 }
 0x2b0   :  { %1703 = vpow2.f32 %v917_v44  ;;  %v899_v6 = vmul.f32 1.442695, %v877_v2 }
 0x2b1   :  { %v2273_v20 = vpop.eup %1685  ;;  %1705 = vpow2.f32 %v891_v30  ;;  %v901_v53 = vmul.f32 1.442695, %v878_v5 }
 0x2b2   :  { %960 = vperm.xlu1 %1651, %v2273_v20   ;;  %v2280_v27 = vpop.eup %1687  ;;  %1707 = vpow2.f32 %v893_v36 }
 0x2b3   :  { %v2282_v28 = vpop.eup %1689  ;;  %1709 = vpow2.f32 %v895_v59 }
 0x2b4   :  { %972 = vperm.xlu0 %1652, %v2282_v28   ;;  %v2289_v47 = vpop.eup %1691  ;;  %1711 = vpow2.f32 %v897_v61 }
 0x2b5   :  { %v2291_v38 = vpop.eup %1693  ;;  %1713 = vpow2.f32 %v899_v6 }
 0x2b6   :  { %963 = vperm.xlu1 %1651, %v2280_v27   ;;  %v2298_v40 = vpop.eup %1695  ;;  %1715 = vpow2.f32 %v901_v53 }
 0x2b7   :  { %v2300_v42 = vpop.eup %1697 }
 0x2b8   :  { %975 = vperm.xlu0 %1652, %v2291_v38   ;;  %v2307_v60 = vpop.eup %1699 }
 0x2b9   :  { %v2309_v4 = vpop.eup %1701 }
 0x2ba   :  { %966 = vperm.xlu1 %1651, %v2289_v47   ;;  %v2316_v3 = vpop.eup %1703 }
 0x2bb   :  { %v2318_v57 = vpop.eup %1705 }
 0x2bc   :  { %936 = vperm.xlu0 %1652, %v2300_v42   ;;  %v2323_v39 = vpop.eup %1707 }
 0x2bd   :  { %v2326_v62 = vpop.eup %1709 }
 0x2be   :  { %969 = vperm.xlu1 %1651, %v2298_v40   ;;  %v2329_v56 = vpop.eup %1711 }
 0x2bf   :  { %v2332_v7 = vpop.eup %1713 }
 0x2c0   :  { %978 = vperm.xlu0 %1652, %v2307_v60   ;;  %v2335_v15 = vpop.eup %1715 }
 0x2c2   :  { %939 = vperm.xlu1 %1651, %v2309_v4  }
 0x2c4   :  { %981 = vperm.xlu0 %1652, %v2316_v3  }
 0x2c6   :  { %942 = vperm.xlu1 %1651, %v2318_v57  }
 0x2ca   :  { %945 = vperm.xlu1 %1651, %v2323_v39  }
 0x2ce   :  { %948 = vperm.xlu1 %1651, %v2326_v62  }
 0x2d2   :  { %951 = vperm.xlu1 %1651, %v2329_v56  }
 0x2d6   :  { %954 = vperm.xlu1 %1651, %v2332_v7  }
 0x2da   :  { %957 = vperm.xlu1 %1651, %v2335_v15  }
 0x331   :  { %v961_v8 = vpop.permute.xlu1 %960 }
 0x332   :  { %v1018_v14 = vrot.slane %v961_v8, %v2167_v52 }
 0x333   :  { %v973_v9 = vpop.permute.xlu0 %972 }
 0x334   :  { %v1034_v41 = vrot.slane %v973_v9, %v2167_v52 }
 0x335   :  { %v964_v46 = vpop.permute.xlu1 %963 }
 0x336   :  { %v1022_v12 = vrot.slane %v964_v46, %v2167_v52 }
 0x337   :  { %v976_v51 = vpop.permute.xlu0 %975 }
 0x338   :  { %v1054_v22 = vsel %vm759_vm1, %v1022_v12, %v1018_v14  ;;  %v1038_v26 = vrot.slane %v976_v51, %v2167_v52 }
 0x339   :  { %v967_v11 = vpop.permute.xlu1 %966 }
 0x33a   :  { %v1026_v13 = vrot.slane %v967_v11, %v2167_v52 }
 0x33b   :  { %v937_v49 = vpop.permute.xlu0 %936 }
 0x33c   :  { %v1055_v0 = vsel %vm761_vm2, %v1026_v13, %v1054_v22  ;;  %v986_v9 = vrot.slane %v937_v49, %v2167_v52 }
 0x33d   :  { %v970_v17 = vpop.permute.xlu1 %969 }
 0x33e   :  { %v1030_v24 = vrot.slane %v970_v17, %v2167_v52 }
 0x33f   :  { %v979_v29 = vpop.permute.xlu0 %978 }
 0x340   :  { %v1056_v44 = vsel %vm763_vm3, %v1030_v24, %v1055_v0  ;;  %v1042_v55 = vrot.slane %v979_v29, %v2167_v52 }
 0x341   :  { %v1057_v10 = vsel %vm765_vm4, %v1034_v41, %v1056_v44  ;;  %v940_v30 = vpop.permute.xlu1 %939 }
 0x342   :  { %v1058_v54 = vsel %vm767_vm5, %v1038_v26, %v1057_v10  ;;  %v990_v53 = vrot.slane %v940_v30, %v2167_v52 }
 0x343   :  { %v982_v36 = vpop.permute.xlu0 %981  ;;  %v1059_v58 = vsel %vm769_vm6, %v1042_v55, %v1058_v54 }
 0x344   :  { %v1046_v59 = vrot.slane %v982_v36, %v2167_v52  ;;  %v1047_v12 = vsel %vm759_vm1, %v990_v53, %v986_v9 }
 0x345   :  { %v943_v48 = vpop.permute.xlu1 %942 }
 0x346   :  { %v1060_v63 = vsel %vm771_vm7, %v1046_v59, %v1059_v58  ;;  %v994_v8 = vrot.slane %v943_v48, %v2167_v52 }
 0x347   :  { %v1066_v2 = vsel %vm782_vm8, %v1060_v63, 0.0 }
 0x348   :  { %1067 = vadd.xlane.f32.xlu0 %v1066_v2  ;;  %v1048_v14 = vsel %vm761_vm2, %v994_v8, %v1047_v12 }
 0x349   :  { %v946_v61 = vpop.permute.xlu1 %945 }
 0x34a   :  { %v998_v46 = vrot.slane %v946_v61, %v2167_v52 }
 0x34c   :  { %v1049_v22 = vsel %vm763_vm3, %v998_v46, %v1048_v14 }
 0x34d   :  { %v949_v5 = vpop.permute.xlu1 %948 }
 0x34e   :  { %v1002_v51 = vrot.slane %v949_v5, %v2167_v52 }
 0x350   :  { %v1050_v24 = vsel %vm765_vm4, %v1002_v51, %v1049_v22 }
 0x351   :  { %v952_v6 = vpop.permute.xlu1 %951 }
 0x352   :  { %v1006_v13 = vrot.slane %v952_v6, %v2167_v52 }
 0x354   :  { %v1051_v49 = vsel %vm767_vm5, %v1006_v13, %v1050_v24 }
 0x355   :  { %v955_v11 = vpop.permute.xlu1 %954 }
 0x356   :  { %v1010_v17 = vrot.slane %v955_v11, %v2167_v52 }
 0x358   :  { %v1052_v26 = vsel %vm769_vm6, %v1010_v17, %v1051_v49 }
 0x359   :  { %v958_v41 = vpop.permute.xlu1 %957 }
 0x35a   :  { %v1014_v0 = vrot.slane %v958_v41, %v2167_v52 }
 0x35c   :  { %v1053_v44 = vsel %vm771_vm7, %v1014_v0, %v1052_v26 }
 0x35d   :  { %v1063_v10 = vsel %vm782_vm8, %v1053_v44, 0.0 }
 0x35e   :  { %1064 = vadd.xlane.f32.xlu1 %v1063_v10 }
 0x3d5   :  { %v1068_v29 = vpop.xlane.xlu0 %1067 }
 0x3d6   :  { %v1110_v30 = vrot.slane %v1068_v29, %v2229_v31  ;;  %v1106_v54 = vrot.slane %v1068_v29, %v2108_v45  ;;  %v1114_v55 = vrot.slane %v1068_v29, %v2232_v33  ;;  %v1118_v36 = vrot.slane %v1068_v29, %v2243_v32 }
 0x3d7   :  { %v1122_v52 = vrot.slane %v1068_v29, %v2235_v35  ;;  %v1126_v58 = vrot.slane %v1068_v29, %v2238_v37  ;;  %v1130_v46 = vrot.slane %v1068_v29, %v2253_v1 }
 0x3d8   :  { %1717 = vrcp.f32 %v1110_v30 }
 0x3d9   :  { %1719 = vrcp.f32 %v1106_v54 }
 0x3da   :  { %1721 = vrcp.f32 %v1114_v55 }
 0x3db   :  { %1723 = vrcp.f32 %v1118_v36 }
 0x3dc   :  { %1725 = vrcp.f32 %v1122_v52 }
 0x3dd   :  { %1727 = vrcp.f32 %v1126_v58  ;;  %v1423_v58 = vadd.s32 4294967264, %v2159_v50 }
 0x3e2   :  { %v1718_v48 = vpop.eup %1717 }
 0x3e3   :  { %v1720_v59 = vpop.eup %1719  ;;  %v1170_v63 = vmul.f32 %v1718_v48, %v2280_v27 }
 0x3e4   :  { %v1722_v2 = vpop.eup %1721  ;;  %v1168_v61 = vmul.f32 %v1720_v59, %v2273_v20  ;;  %v1134_v20 = vrot.slane %v1068_v29, %v2261_v43 }
 0x3e5   :  { %1230 = vperm.xlu0 %1652, %v1170_v63   ;;  %v1172_v5 = vmul.f32 %v1722_v2, %v2289_v47  ;;  %v1724_v6 = vpop.eup %1723 }
 0x3e6   :  { %1225 = vperm.xlu1 %1651, %v1168_v61   ;;  %v1174_v51 = vmul.f32 %v1724_v6, %v2298_v40  ;;  %v1726_v11 = vpop.eup %1725 }
 0x3e7   :  { %v1176_v47 = vmul.f32 %v1726_v11, %v2282_v28  ;;  %v1728_v12 = vpop.eup %1727 }
 0x3e9   :  { %1235 = vperm.xlu0 %1652, %v1172_v5   ;;  %v2416_v5 = vsub.s32 %v1423_v58, %v2104_v34 }
 0x3eb   :  { %v1065_v53 = vpop.xlane.xlu1 %1064 }
 0x3ec   :  { %v1074_v8 = vrot.slane %v1065_v53, %v2108_v45  ;;  %v1078_v9 = vrot.slane %v1065_v53, %v2229_v31  ;;  %v1082_v27 = vrot.slane %v1065_v53, %v2232_v33  ;;  %v1086_v45 = vrot.slane %v1065_v53, %v2243_v32 }
 0x3ed   :  { %1240 = vperm.xlu0 %1652, %v1174_v51   ;;  %v1178_v31 = vmul.f32 %v1728_v12, %v2291_v38  ;;  %v1090_v33 = vrot.slane %v1065_v53, %v2235_v35  ;;  %v1094_v17 = vrot.slane %v1065_v53, %v2238_v37  ;;  %v1098_v38 = vrot.slane %v1065_v53, %v2253_v1 }
 0x3ee   :  { %1729 = vrcp.f32 %v1074_v8  ;;  %v1102_v37 = vrot.slane %v1065_v53, %v2261_v43 }
 0x3ef   :  { %1731 = vrcp.f32 %v1078_v9 }
 0x3f0   :  { %1733 = vrcp.f32 %v1130_v46 }
 0x3f1   :  { %1735 = vrcp.f32 %v1082_v27  ;;  %1245 = vperm.xlu0 %1652, %v1176_v47  }
 0x3f2   :  { %1737 = vrcp.f32 %v1134_v20 }
 0x3f3   :  { %1739 = vrcp.f32 %v1086_v45 }
 0x3f4   :  { %1741 = vrcp.f32 %v1090_v33 }
 0x3f5   :  { %1250 = vperm.xlu0 %1652, %v1178_v31   ;;  %1743 = vrcp.f32 %v1094_v17 }
 0x3f6   :  { %1745 = vrcp.f32 %v1098_v38 }
 0x3f7   :  { %1747 = vrcp.f32 %v1102_v37 }
 0x3f8   :  { %v1730_v40 = vpop.eup %1729 }
 0x3f9   :  { %v1732_v13 = vpop.eup %1731  ;;  %v1152_v14 = vmul.f32 %v1730_v40, %v2300_v42 }
 0x3fa   :  { %v1734_v28 = vpop.eup %1733  ;;  %v1154_v22 = vmul.f32 %v1732_v13, %v2309_v4 }
 0x3fb   :  { %v1736_v32 = vpop.eup %1735  ;;  %1185 = vperm.xlu0 %1652, %v1152_v14   ;;  %v1180_v24 = vmul.f32 %v1734_v28, %v2307_v60  ;;  %v1749_v28 = vld [vmem:[#allocation5] sm:$0xff] }
 0x3fc   :  { %1190 = vperm.xlu1 %1651, %v1154_v22   ;;  %v1738_v35 = vpop.eup %1737  ;;  %v1156_v41 = vmul.f32 %v1736_v32, %v2318_v57 }
 0x3fd   :  { %v1740_v49 = vpop.eup %1739  ;;  %v1182_v42 = vmul.f32 %v1738_v35, %v2316_v3  ;;  %v1750_v35 = vld [vmem:[#allocation5 + $0x8] sm:$0xff] }
 0x3fe   :  { %v1158_v4 = vmul.f32 %v1740_v49, %v2323_v39  ;;  %v1742_v0 = vpop.eup %1741 }
 0x3ff   :  { %1255 = vperm.xlu0 %1652, %v1180_v24   ;;  %v1160_v60 = vmul.f32 %v1742_v0, %v2326_v62  ;;  %v1744_v1 = vpop.eup %1743 }
 0x400   :  { %1195 = vperm.xlu1 %1651, %v1156_v41   ;;  %v1162_v57 = vmul.f32 %v1744_v1, %v2329_v56  ;;  %v1746_v26 = vpop.eup %1745 }
 0x401   :  { %v1164_v44 = vmul.f32 %v1746_v26, %v2332_v7  ;;  %v1748_v3 = vpop.eup %1747 }
 0x402   :  { %v1166_v43 = vmul.f32 %v1748_v3, %v2335_v15 }
 0x403   :  { %1260 = vperm.xlu0 %1652, %v1182_v42  }
 0x404   :  { %1200 = vperm.xlu1 %1651, %v1158_v4   ;;  %v1751_v4 = vld [vmem:[#allocation5 + $0x70] sm:$0xff] }
 0x408   :  { %1205 = vperm.xlu1 %1651, %v1160_v60  }
 0x40c   :  { %1210 = vperm.xlu1 %1651, %v1162_v57  }
 0x410   :  { %1215 = vperm.xlu1 %1651, %v1164_v44  }
 0x414   :  { %1220 = vperm.xlu1 %1651, %v1166_v43  }
 0x464   :  { %v1231_v39 = vpop.permute.xlu0 %1230 }
 0x465   :  { %v1272_v10 = vmul.f32 %v1231_v39, %v2075_v18  ;;  %v1226_v29 = vpop.permute.xlu1 %1225  ;;  %v1463_v11 = vrot.slane %v1231_v39, %v2416_v5 }
 0x466   :  { %v1271_v30 = vmul.f32 %v1226_v29, %v2069_v16  ;;  %v1459_v34 = vrot.slane %v1226_v29, %v2416_v5 }
 0x467   :  { %v1342_v62 = vsel %vm132_vm0, %v1272_v10, 0.0  ;;  %v1752_v10 = vld [vmem:[#allocation5 + $0x10] sm:$0xff] }
 0x468   :  { %v1236_v54 = vpop.permute.xlu0 %1235  ;;  %v1335_v56 = vsel %vm132_vm0, %v1271_v30, 0.0  ;;  %v1343_v36 = vrot.slane %v1342_v62, 4  ;;  %v1495_v24 = vsel %vm759_vm1, %v1463_v11, %v1459_v34 }
 0x469   :  { %v1273_v55 = vmul.f32 %v1236_v54, %v2078_v19  ;;  %v1336_v7 = vrot.slane %v1335_v56, 4  ;;  %v1467_v31 = vrot.slane %v1236_v54, %v2416_v5 }
 0x46a   :  { %v1344_v18 = vadd.f32 %v1343_v36, %v1342_v62 }
 0x46b   :  { %v1349_v48 = vsel %vm132_vm0, %v1273_v55, 0.0  ;;  %v1337_v16 = vadd.f32 %v1336_v7, %v1335_v56  ;;  %v1496_v42 = vsel %vm761_vm2, %v1467_v31, %v1495_v24 }
 0x46c   :  { %v1241_v52 = vpop.permute.xlu0 %1240  ;;  %v1350_v63 = vrot.slane %v1349_v48, 4  ;;  %v1345_v6 = vrot.slane %v1344_v18, 2 }
 0x46d   :  { %v1274_v15 = vmul.f32 %v1241_v52, %v2084_v21  ;;  %v1338_v21 = vrot.slane %v1337_v16, 2 }
 0x46e   :  { %v1351_v8 = vadd.f32 %v1350_v63, %v1349_v48  ;;  %v1346_v27 = vadd.f32 %v1345_v6, %v1344_v18  ;;  %v1753_v48 = vld [vmem:[#allocation5 + $0x78] sm:$0xff] }
 0x46f   :  { %v1356_v59 = vsel %vm132_vm0, %v1274_v15, 0.0  ;;  %v1339_v20 = vadd.f32 %v1338_v21, %v1337_v16  ;;  %v1754_v6 = vld [vmem:[#allocation5 + $0x18] sm:$0xff] }
 0x470   :  { %v2411_v2 = vpop.permute.xlu0 %1245  ;;  %v1357_v19 = vrot.slane %v1356_v59, 4  ;;  %v1352_v47 = vrot.slane %v1351_v8, 2  ;;  %v1347_v17 = vrot.slane %v1346_v27, 1 }
 0x471   :  { %v1275_v61 = vmul.f32 %v2411_v2, %v2086_v23  ;;  %v1340_v32 = vrot.slane %v1339_v20, 1  ;;  %v1475_v26 = vrot.slane %v2411_v2, %v2416_v5 }
 0x472   :  { %v1358_v51 = vadd.f32 %v1357_v19, %v1356_v59  ;;  %v1353_v38 = vadd.f32 %v1352_v47, %v1351_v8  ;;  %v1348_v3 = vadd.f32 %v1347_v17, %v1346_v27 }
 0x473   :  { %v1363_v53 = vsel %vm132_vm0, %v1275_v61, 0.0  ;;  %v1341_v30 = vadd.f32 %v1340_v32, %v1339_v20 }
 0x474   :  { %v2419_v50 = vpop.permute.xlu0 %1250  ;;  %v1364_v9 = vrot.slane %v1363_v53, 4  ;;  %v1359_v13 = vrot.slane %v1358_v51, 2  ;;  %v1354_v62 = vrot.slane %v1353_v38, 1 }
 0x475   :  { %v1276_v46 = vmul.f32 %v2419_v50, %v2094_v25  ;;  %v1471_v25 = vrot.slane %v1241_v52, %v2416_v5  ;;  %v1479_v54 = vrot.slane %v2419_v50, %v2416_v5  ;;  %v1414_v21 = vsel %vm759_vm1, %v1348_v3, %v1341_v30  ;;  %v1756_v3 = vld [vmem:[#allocation5 + $0x28] sm:$0xff] }
 0x476   :  { %v1365_v33 = vadd.f32 %v1364_v9, %v1363_v53  ;;  %v1360_v1 = vadd.f32 %v1359_v13, %v1358_v51  ;;  %v1355_v8 = vadd.f32 %v1354_v62, %v1353_v38 }
 0x477   :  { %v1370_v23 = vsel %vm132_vm0, %v1276_v46, 0.0  ;;  %v1497_v57 = vsel %vm763_vm3, %v1471_v25, %v1496_v42  ;;  %v1755_v25 = vld [vmem:[#allocation5 + $0x20] sm:$0xff] }
 0x478   :  { %v1371_v45 = vrot.slane %v1370_v23, 4  ;;  %v1366_v37 = vrot.slane %v1365_v33, 2  ;;  %v1361_v18 = vrot.slane %v1360_v1, 1  ;;  %v1498_v59 = vsel %vm765_vm4, %v1475_v26, %v1497_v57 }
 0x479   :  { %v1499_v51 = vsel %vm767_vm5, %v1479_v54, %v1498_v59  ;;  %v1415_v17 = vsel %vm761_vm2, %v1355_v8, %v1414_v21 }
 0x47a   :  { %v2426_v12 = vpop.permute.xlu0 %1185  ;;  %v1372_v14 = vadd.f32 %v1371_v45, %v1370_v23  ;;  %v1367_v36 = vadd.f32 %v1366_v37, %v1365_v33  ;;  %v1362_v20 = vadd.f32 %v1361_v18, %v1360_v1 }
 0x47b   :  { %v2429_v40 = vpop.permute.xlu1 %1190  ;;  %v1263_v22 = vmul.f32 %v1749_v28, %v2426_v12 }
 0x47c   :  { %v1264_v41 = vmul.f32 %v1750_v35, %v2429_v40  ;;  %v1373_v44 = vrot.slane %v1372_v14, 2  ;;  %v1368_v46 = vrot.slane %v1367_v36, 1  ;;  %v1416_v37 = vsel %vm763_vm3, %v1362_v20, %v1415_v17 }
 0x47d   :  { %v1279_v43 = vsel %vm132_vm0, %v1263_v22, 0.0  ;;  %v1427_v17 = vrot.slane %v2426_v12, %v2416_v5 }
 0x47e   :  { %v2435_v49 = vpop.permute.xlu0 %1255  ;;  %v1286_v56 = vsel %vm132_vm0, %v1264_v41, 0.0  ;;  %v1374_v16 = vadd.f32 %v1373_v44, %v1372_v14  ;;  %v1280_v63 = vrot.slane %v1279_v43, 4  ;;  %v1369_v24 = vadd.f32 %v1368_v46, %v1367_v36 }
 0x47f   :  { %v1277_v0 = vmul.f32 %v1751_v4, %v2435_v49  ;;  %v2439_v60 = vpop.permute.xlu1 %1195  ;;  %v1287_v2 = vrot.slane %v1286_v56, 4  ;;  %v1483_v28 = vrot.slane %v2435_v49, %v2416_v5 }
 0x480   :  { %v1265_v29 = vmul.f32 %v1752_v10, %v2439_v60  ;;  %v1375_v34 = vrot.slane %v1374_v16, 1  ;;  %v1281_v47 = vadd.f32 %v1280_v63, %v1279_v43  ;;  %v1417_v30 = vsel %vm765_vm4, %v1369_v24, %v1416_v37 }
 0x481   :  { %v1377_v39 = vsel %vm132_vm0, %v1277_v0, 0.0  ;;  %v1288_v31 = vadd.f32 %v1287_v2, %v1286_v56  ;;  %v1500_v62 = vsel %vm769_vm6, %v1483_v28, %v1499_v51  ;;  %v1431_v28 = vrot.slane %v2429_v40, %v2416_v5 }
 0x482   :  { %v2450_v55 = vpop.permute.xlu0 %1260  ;;  %v1378_v7 = vrot.slane %v1377_v39, 4  ;;  %v1293_v52 = vsel %vm132_vm0, %v1265_v29, 0.0  ;;  %v1376_v4 = vadd.f32 %v1375_v34, %v1374_v16  ;;  %v1282_v57 = vrot.slane %v1281_v47, 2  ;;  %v1757_v16 = vld [vmem:[#allocation5 + $0x30] sm:$0xff] }
 0x483   :  { %v1278_v15 = vmul.f32 %v1753_v48, %v2450_v55  ;;  %v2454_v58 = vpop.permute.xlu1 %1200  ;;  %v1294_v50 = vrot.slane %v1293_v52, 4  ;;  %v1289_v26 = vrot.slane %v1288_v31, 2  ;;  %v1487_v10 = vrot.slane %v2450_v55, %v2416_v5 }
 0x484   :  { %v1379_v61 = vadd.f32 %v1378_v7, %v1377_v39  ;;  %v1266_v53 = vmul.f32 %v1754_v6, %v2454_v58  ;;  %v1283_v18 = vadd.f32 %v1282_v57, %v1281_v47  ;;  %v1439_v57 = vrot.slane %v2454_v58, %v2416_v5 }
 0x485   :  { %v1384_v19 = vsel %vm132_vm0, %v1278_v15, 0.0  ;;  %v1295_v22 = vadd.f32 %v1294_v50, %v1293_v52  ;;  %v1418_v15 = vsel %vm767_vm5, %v1376_v4, %v1417_v30  ;;  %v1290_v59 = vadd.f32 %v1289_v26, %v1288_v31 }
 0x486   :  { %v1385_v9 = vrot.slane %v1384_v19, 4  ;;  %v1380_v27 = vrot.slane %v1379_v61, 2  ;;  %v1300_v11 = vsel %vm132_vm0, %v1266_v53, 0.0  ;;  %v1284_v20 = vrot.slane %v1283_v18, 1 }
 0x487   :  { %v2462_v23 = vpop.permute.xlu1 %1205  ;;  %v1301_v13 = vrot.slane %v1300_v11, 4  ;;  %v1296_v43 = vrot.slane %v1295_v22, 2  ;;  %v1291_v34 = vrot.slane %v1290_v59, 1  ;;  %v1435_v4 = vrot.slane %v2439_v60, %v2416_v5 }
 0x488   :  { %v1386_v45 = vadd.f32 %v1385_v9, %v1384_v19  ;;  %v1381_v33 = vadd.f32 %v1380_v27, %v1379_v61  ;;  %v1267_v14 = vmul.f32 %v1755_v25, %v2462_v23  ;;  %v1501_v61 = vsel %vm771_vm7, %v1487_v10, %v1500_v62  ;;  %v1758_v27 = vld [vmem:[#allocation5 + $0x38] sm:$0xff] }
 0x489   :  { %v1302_v35 = vadd.f32 %v1301_v13, %v1300_v11  ;;  %v1297_v2 = vadd.f32 %v1296_v43, %v1295_v22  ;;  %v1285_v24 = vadd.f32 %v1284_v20, %v1283_v18  ;;  %v1488_v12 = vsel %vm759_vm1, %v1431_v28, %v1427_v17 }
 0x48a   :  { %v1387_v32 = vrot.slane %v1386_v45, 2  ;;  %v1382_v38 = vrot.slane %v1381_v33, 1  ;;  %v1307_v41 = vsel %vm132_vm0, %v1267_v14, 0.0  ;;  %v1443_v40 = vrot.slane %v2462_v23, %v2416_v5 }
 0x48b   :  { %v2469_v42 = vpop.permute.xlu1 %1210  ;;  %v1308_v1 = vrot.slane %v1307_v41, 4  ;;  %v1303_v54 = vrot.slane %v1302_v35, 2 }
 0x48c   :  { %v1388_v0 = vadd.f32 %v1387_v32, %v1386_v45  ;;  %v1383_v44 = vadd.f32 %v1382_v38, %v1381_v33  ;;  %v1268_v49 = vmul.f32 %v1756_v3, %v2469_v42  ;;  %v1298_v45 = vrot.slane %v1297_v2, 1 }
 0x48d   :  { %v1309_v29 = vadd.f32 %v1308_v1, %v1307_v41  ;;  %v1304_v53 = vadd.f32 %v1303_v54, %v1302_v35  ;;  %v1292_v38 = vadd.f32 %v1291_v34, %v1290_v59 }
 0x48e   :  { %v1389_v39 = vrot.slane %v1388_v0, 1  ;;  %v1314_v56 = vsel %vm132_vm0, %v1268_v49, 0.0  ;;  %v1419_v63 = vsel %vm769_vm6, %v1383_v44, %v1418_v15  ;;  %v1299_v37 = vadd.f32 %v1298_v45, %v1297_v2 }
 0x48f   :  { %v2478_v36 = vpop.permute.xlu1 %1215  ;;  %v1310_v52 = vrot.slane %v1309_v29, 2  ;;  %v1315_v48 = vrot.slane %v1314_v56, 4  ;;  %v1305_v25 = vrot.slane %v1304_v53, 1  ;;  %v1407_v49 = vsel %vm759_vm1, %v1292_v38, %v1285_v24 }
 0x490   :  { %v1390_v7 = vadd.f32 %v1389_v39, %v1388_v0  ;;  %v1269_v55 = vmul.f32 %v1757_v16, %v2478_v36  ;;  %v1447_v39 = vrot.slane %v2469_v42, %v2416_v5  ;;  %v1408_v10 = vsel %vm761_vm2, %v1299_v37, %v1407_v49 }
 0x491   :  { %v1316_v19 = vadd.f32 %v1315_v48, %v1314_v56  ;;  %v1311_v9 = vadd.f32 %v1310_v52, %v1309_v29  ;;  %v1306_v1 = vadd.f32 %v1305_v25, %v1304_v53  ;;  %v1489_v29 = vsel %vm761_vm2, %v1435_v4, %v1488_v12 }
 0x492   :  { %v1420_v6 = vsel %vm771_vm7, %v1390_v7, %v1419_v63  ;;  %v1321_v21 = vsel %vm132_vm0, %v1269_v55, 0.0  ;;  %v1451_v30 = vrot.slane %v2478_v36, %v2416_v5  ;;  %v1490_v23 = vsel %vm763_vm3, %v1439_v57, %v1489_v29 }
 0x493   :  { %v1221_v8 = vpop.permute.xlu1 %1220  ;;  %v1505_v50 = vsel %vm132_vm0, %v1420_v6, %v1501_v61  ;;  %v1317_v46 = vrot.slane %v1316_v19, 2  ;;  %v1322_v51 = vrot.slane %v1321_v21, 4  ;;  %v1312_v22 = vrot.slane %v1311_v9, 1 }
 0x494   :  { %v1270_v11 = vmul.f32 %v1758_v27, %v1221_v8  ;;  %v1508_v47 = vsel %vm1506_vm9, %v1505_v50, 0.0  ;;  %v1409_v62 = vsel %vm763_vm3, %v1306_v1, %v1408_v10  ;;  %v1455_v56 = vrot.slane %v1221_v8, %v2416_v5 }
 0x495   :  { %v1318_v31 = vadd.f32 %v1317_v46, %v1316_v19  ;;  %v1323_v33 = vadd.f32 %v1322_v51, %v1321_v21  ;;  %1510 = vst [vmem:[#allocation13 + $0x8] sm:$0xff] %v1508_v47  ;;  %v1313_v44 = vadd.f32 %v1312_v22, %v1311_v9  ;;  %v1491_v42 = vsel %vm765_vm4, %v1443_v40, %v1490_v23 }
 0x496   :  { %v1328_v13 = vsel %vm132_vm0, %v1270_v11, 0.0  ;;  %v1492_v52 = vsel %vm767_vm5, %v1447_v39, %v1491_v42 }
 0x497   :  { %v1329_v14 = vrot.slane %v1328_v13, 4  ;;  %v1324_v32 = vrot.slane %v1323_v33, 2  ;;  %v1319_v35 = vrot.slane %v1318_v31, 1  ;;  %v1410_v7 = vsel %vm765_vm4, %v1313_v44, %v1409_v62 }
 0x498   :  { %v1493_v36 = vsel %vm769_vm6, %v1451_v30, %v1492_v52 }
 0x499   :  { %v1330_v41 = vadd.f32 %v1329_v14, %v1328_v13  ;;  %v1325_v0 = vadd.f32 %v1324_v32, %v1323_v33  ;;  %v1320_v43 = vadd.f32 %v1319_v35, %v1318_v31  ;;  %v1494_v59 = vsel %vm771_vm7, %v1455_v56, %v1493_v36 }
 0x49b   :  { %v1331_v26 = vrot.slane %v1330_v41, 2  ;;  %v1326_v3 = vrot.slane %v1325_v0, 1  ;;  %v1411_v15 = vsel %vm767_vm5, %v1320_v43, %v1410_v7 }
 0x49d   :  { %v1332_v60 = vadd.f32 %v1331_v26, %v1330_v41  ;;  %v1327_v58 = vadd.f32 %v1326_v3, %v1325_v0 }
 0x49f   :  { %v1333_v54 = vrot.slane %v1332_v60, 1  ;;  %v1412_v18 = vsel %vm769_vm6, %v1327_v58, %v1411_v15 }
 0x4a1   :  { %v1334_v48 = vadd.f32 %v1333_v54, %v1332_v60 }
 0x4a3   :  { %v1413_v16 = vsel %vm771_vm7, %v1334_v48, %v1412_v18 }
 0x4a4   :  { %v1504_v5 = vsel %vm132_vm0, %v1413_v16, %v1494_v59 }
 0x4a5   :  { %v1507_v55 = vsel %vm1506_vm9, %v1504_v5, 0.0 }
 0x4a6   :  { %1509 = vst [vmem:[#allocation13] sm:$0xff] %v1507_v55 }
 0x4a7   :  { %1902 = shalt.err (!%p1899_p10)
}
 0x4a8   :  { %s1903_s25 = scalar_lea.hbm %s2541_s6, 256 }
 0x4a9   :  { %p1904_p11 = scmp.ne.s32.totalorder %s2541_s6, %s1903_s25  ;;  %p1907_p12 = scmp.lt.u32.totalorder %s1903_s25, %s2541_s6 }
 0x4ab   :  { %p1909_p13 = pnand %p1907_p12, %p1904_p11 }
 0x4ad   :  { %1912 = shalt.err (!%p1909_p13)
}
 0x4ae   :  { %1522 = dma.vmem_to_hbm [thread:$0]  %s1517_s1, 256, %s2541_s6, [#allocation4], %s1925_s9, %s1925_s9, %s1926_s10  }
 0x4af   :  { %1921 = dma.done.wait [#allocation4], 256  }
 0x4b0   :  { %1922 = vsyncadd [#allocation4], 4294967040 }
 0x4b1   :  { %1526 = vsyncpa [#allocation3], 1 }
 0x4b2   :  { %1527 = vsyncpa [#allocation6], 1 }
 0x4b3   :  { %1528 = vsyncpa [#allocation9], 1 }
 0x4b4   :  { %1529 = vsyncpa [#allocation12], 1 }
 0x4b5   :  { %1530 = vsyncpa [#allocation4], 1 }

</bundles_post_ra>
